<compile_context>
chip_gen: v7x
topology: tpu7x:2x2x1
jax: 0.10.0
libtpu: 0.0.40
codegen_flags: <defaults>
</compile_context>

<pallas_src>
import jax
import jax.numpy as jnp
from jax.experimental import pallas as pl
from jax.experimental.pallas import tpu as pltpu


def _round_up(v, m):
    return (v + m - 1) // m * m


def _final_layer_kernel(x_ref, shift_ref, scale1_ref, w_ref, b_ref, o_ref):
    """One (batch, sequence-tile) block.

    x_ref:      (1, TN, H)   token tile, input dtype
    shift_ref:  (1, 1, H)    f32 adaLN shift for this batch element
    scale1_ref: (1, 1, H)    f32 (adaLN scale + 1) for this batch element
    w_ref:      (H, PCp)     final linear weight (input dtype), PC padded to 128
    b_ref:      (1, PC)      f32 final linear bias (unpadded)
    o_ref:      (1, TN, PC)  output tile (unpadded channel dim)
    """
    pc = o_ref.shape[-1]

    # ---- LayerNorm (no affine, eps=1e-6) in float32 ----
    x = x_ref[0].astype(jnp.float32)                         # (TN, H)
    mean = jnp.mean(x, axis=-1, keepdims=True)
    centered = x - mean
    var = jnp.mean(centered * centered, axis=-1, keepdims=True)
    x_norm = centered * jax.lax.rsqrt(var + 1e-6)

    # ---- modulate: x * (scale + 1) + shift in f32, one cast before the MXU ----
    x_mod = (x_norm * scale1_ref[0] + shift_ref[0]).astype(x_ref.dtype)

    # ---- final linear: MXU in input dtype, f32 accumulation ----
    out = jnp.dot(x_mod, w_ref[...], preferred_element_type=jnp.float32)  # (TN, PCp)
    out = out[:, :pc] + b_ref[...]                           # crop pad lanes + bias
    o_ref[0] = out.astype(o_ref.dtype)


def _vmem_capacity_bytes():
    try:
        cap = getattr(pltpu.get_tpu_info(), "vmem_capacity_bytes", None)
        if cap:
            return int(cap)
    except Exception:
        pass
    return 64 * 1024 * 1024            # conservative: v7x per-TensorCore VMEM


def _choose_tn(B, N, H, PC, x_itemsize, vmem_limit):
    """Largest sequence tile whose buffers + f32 temporaries fit the VMEM budget."""
    if N < 8:
        return N                        # block must equal the full (short) dim
    # Double-buffered x/out tiles plus ~4 full-tile f32 LN temporaries per row.
    per_row = 2 * H * x_itemsize + 2 * PC * x_itemsize + 4 * H * 4
    tn = (vmem_limit // 2) // max(per_row, 1)
    tn = max(8, (tn // 8) * 8)
    # Larger caps than before (amortize ~0.35us per-grid-step overhead).
    tn = min(tn, 1536 if vmem_limit <= 48 * 1024 * 1024 else 2048)
    # Keep >= ~4 total grid steps so v7x's two TensorCores both get work.
    want_n_tiles = max(1, -(-4 // max(B, 1)))
    if want_n_tiles > 1 and N >= want_n_tiles * 8:
        tn = min(tn, _round_up(-(-N // want_n_tiles), 8))
    # No point exceeding the sequence length (keep a multiple of 8).
    tn = min(tn, (N // 8) * 8)
    return int(tn)


def final_layer_pallas(x, c, w_ada, b_ada, w_lin, b_lin, *, tn=None):
    """x: (B, N, H); c: (B, H); weights stored as (in_features, out_features)."""
    B, N, H = x.shape
    PC = w_lin.shape[1]
    in_dtype = x.dtype

    # adaLN modulation hoisted out of the kernel: (B,H)@(H,2H) is trivial for XLA
    # and keeping it in-kernel wastes an MXU pass plus VMEM for the 2H-wide weight.
    c32 = c.astype(jnp.float32)
    ada = ((c32 * jax.nn.sigmoid(c32)) @ w_ada.astype(jnp.float32)
           + b_ada.astype(jnp.float32))                       # (B, 2H)
    shift = ada[:, :H].reshape(B, 1, H)
    scale_p1 = ada[:, H:].reshape(B, 1, H) + 1.0              # (scale + 1) hoisted

    # Pad weight output channels to 128 lanes (clean MXU/VMEM layout); the kernel
    # crops back to PC in registers, so no padded output array / no post-slice.
    PCp = _round_up(PC, 128)
    w_pad = jnp.pad(w_lin.astype(in_dtype), ((0, 0), (0, PCp - PC)))
    b2d = b_lin.astype(jnp.float32).reshape(1, PC)

    vmem_cap = _vmem_capacity_bytes()
    vmem_limit = int(min(vmem_cap * 3 // 4, 100 * 1024 * 1024))
    if tn is None:
        tn = _choose_tn(B, N, H, PC, jnp.dtype(in_dtype).itemsize, vmem_limit)
    grid = (B, pl.cdiv(N, tn))          # ragged last block handled by Pallas

    grid_spec = pltpu.PrefetchScalarGridSpec(
        num_scalar_prefetch=0,
        grid=grid,
        in_specs=[
            pl.BlockSpec((1, tn, H), lambda b, s: (b, s, 0)),    # x tile
            pl.BlockSpec((1, 1, H), lambda b, s: (b, 0, 0)),     # shift
            pl.BlockSpec((1, 1, H), lambda b, s: (b, 0, 0)),     # scale + 1
            pl.BlockSpec((H, PCp), lambda b, s: (0, 0)),         # weight (resident)
            pl.BlockSpec((1, PC), lambda b, s: (0, 0)),          # bias (resident)
        ],
        out_specs=pl.BlockSpec((1, tn, PC), lambda b, s: (b, s, 0)),
    )

    return pl.pallas_call(
        _final_layer_kernel,
        out_shape=jax.ShapeDtypeStruct((B, N, PC), in_dtype),
        grid_spec=grid_spec,
        compiler_params=pltpu.CompilerParams(
            # Both axes independent -> megacore sharding on v7x's two TCs.
            dimension_semantics=("parallel", "parallel"),
            vmem_limit_bytes=vmem_limit,
        ),
    )(x, shift, scale_p1, w_pad, b2d)


def final_layer_ref(x, c, w_ada, b_ada, w_lin, b_lin):
    """Pure-JAX reference mirroring the PyTorch forward."""
    H = x.shape[-1]
    c32 = c.astype(jnp.float32)
    ada = (c32 * jax.nn.sigmoid(c32)) @ w_ada.astype(jnp.float32) + b_ada
    shift, scale = ada[:, :H], ada[:, H:]
    x32 = x.astype(jnp.float32)
    mean = jnp.mean(x32, axis=-1, keepdims=True)
    var = jnp.mean((x32 - mean) ** 2, axis=-1, keepdims=True)
    xn = ((x32 - mean) * jax.lax.rsqrt(var + 1e-6)).astype(x.dtype)
    xm = (xn.astype(jnp.float32) * (scale[:, None, :] + 1.0)
          + shift[:, None, :]).astype(x.dtype)
    out = xm.astype(jnp.float32) @ w_lin.astype(jnp.float32) + b_lin
    return out.astype(x.dtype)


if __name__ == "__main__":
    # Small, module-consistent shapes.
    B, N = 2, 8              # batch, sequence length
    hidden_size = 32
    patch_size = 2
    out_channels = 4
    PC = patch_size * out_channels

    key = jax.random.PRNGKey(0)
    kx, kc, kw1, kb1, kw2, kb2 = jax.random.split(key, 6)

    x = jax.random.normal(kx, (B, N, hidden_size), dtype=jnp.float32)
    c = jax.random.normal(kc, (B, hidden_size), dtype=jnp.float32)

    # Deterministic synthetic parameters (stored as (in_features, out_features)).
    w_ada = 0.05 * jax.random.normal(kw1, (hidden_size, 2 * hidden_size), jnp.float32)
    b_ada = 0.01 * jax.random.normal(kb1, (2 * hidden_size,), jnp.float32)
    w_lin = 0.05 * jax.random.normal(kw2, (hidden_size, PC), jnp.float32)
    b_lin = 0.01 * jax.random.normal(kb2, (PC,), jnp.float32)

    out = final_layer_pallas(x, c, w_ada, b_ada, w_lin, b_lin)
    out = jax.block_until_ready(out)

    ref = final_layer_ref(x, c, w_ada, b_ada, w_lin, b_lin)
    assert out.shape == (B, N, PC)
    assert jnp.allclose(out, ref, atol=1e-4, rtol=1e-4)

    print("KERNEL_OK")
</pallas_src>

<mosaic_0001>
module attributes {stable_mosaic.version = 11 : i64} {
  func.func @_final_layer_kernel(%arg0: i32, %arg1: i32, %arg2: memref<1x8x32xf32, #tpu.memory_space<vmem>>, %arg3: memref<1x1x32xf32, #tpu.memory_space<vmem>>, %arg4: memref<1x1x32xf32, #tpu.memory_space<vmem>>, %arg5: memref<32x128xf32, #tpu.memory_space<vmem>>, %arg6: memref<1x8xf32, #tpu.memory_space<vmem>>, %arg7: memref<1x8x8xf32, #tpu.memory_space<vmem>>) attributes {dimension_semantics = [#tpu.dimension_semantics<parallel>, #tpu.dimension_semantics<parallel>], iteration_bounds = array<i64: 2, 1>, scalar_prefetch = 0 : i64, scratch_operands = 0 : i64, tpu.core_type = #tpu.core_type<tc>, window_params = [{transform_indices = @transform_0, window_bounds = array<i64: 1, 8, 32>}, {transform_indices = @transform_1, window_bounds = array<i64: 1, 1, 32>}, {transform_indices = @transform_2, window_bounds = array<i64: 1, 1, 32>}, {pipeline_mode = #tpu.pipeline_mode<synchronous>, transform_indices = @transform_3, window_bounds = array<i64: 32, 128>}, {pipeline_mode = #tpu.pipeline_mode<synchronous>, transform_indices = @transform_4, window_bounds = array<i64: 1, 8>}, {transform_indices = @transform_5, window_bounds = array<i64: 1, 8, 8>}]} {
    %c0 = arith.constant 0 : index
    %c0_0 = arith.constant 0 : index
    %c0_1 = arith.constant 0 : index
    %0 = vector.load %arg2[%c0, %c0_0, %c0_1] : memref<1x8x32xf32, #tpu.memory_space<vmem>>, vector<1x8x32xf32>
    %1 = vector.shape_cast %0 : vector<1x8x32xf32> to vector<8x32xf32>
    %cst = arith.constant dense<0.000000e+00> : vector<8xf32>
    %2 = vector.multi_reduction <add>, %1, %cst [1] : vector<8x32xf32> to vector<8xf32>
    %3 = vector.shape_cast %2 : vector<8xf32> to vector<8x1xf32>
    %cst_2 = arith.constant 3.200000e+01 : f32
    %4 = vector.broadcast %cst_2 : f32 to vector<8x1xf32>
    %5 = arith.divf %3, %4 : vector<8x1xf32>
    %6 = vector.broadcast %5 : vector<8x1xf32> to vector<8x32xf32>
    %7 = arith.subf %1, %6 : vector<8x32xf32>
    %8 = arith.mulf %7, %7 : vector<8x32xf32>
    %cst_3 = arith.constant dense<0.000000e+00> : vector<8xf32>
    %9 = vector.multi_reduction <add>, %8, %cst_3 [1] : vector<8x32xf32> to vector<8xf32>
    %10 = vector.shape_cast %9 : vector<8xf32> to vector<8x1xf32>
    %cst_4 = arith.constant 3.200000e+01 : f32
    %11 = vector.broadcast %cst_4 : f32 to vector<8x1xf32>
    %12 = arith.divf %10, %11 : vector<8x1xf32>
    %cst_5 = arith.constant 9.99999997E-7 : f32
    %13 = vector.broadcast %cst_5 : f32 to vector<8x1xf32>
    %14 = arith.addf %12, %13 : vector<8x1xf32>
    %15 = math.rsqrt %14 : vector<8x1xf32>
    %16 = vector.broadcast %15 : vector<8x1xf32> to vector<8x32xf32>
    %17 = arith.mulf %7, %16 : vector<8x32xf32>
    %c0_6 = arith.constant 0 : index
    %c0_7 = arith.constant 0 : index
    %c0_8 = arith.constant 0 : index
    %18 = vector.load %arg4[%c0_6, %c0_7, %c0_8] : memref<1x1x32xf32, #tpu.memory_space<vmem>>, vector<1x1x32xf32>
    %19 = vector.shape_cast %18 : vector<1x1x32xf32> to vector<1x32xf32>
    %20 = vector.broadcast %19 : vector<1x32xf32> to vector<8x32xf32>
    %21 = arith.mulf %17, %20 : vector<8x32xf32>
    %c0_9 = arith.constant 0 : index
    %c0_10 = arith.constant 0 : index
    %c0_11 = arith.constant 0 : index
    %22 = vector.load %arg3[%c0_9, %c0_10, %c0_11] : memref<1x1x32xf32, #tpu.memory_space<vmem>>, vector<1x1x32xf32>
    %23 = vector.shape_cast %22 : vector<1x1x32xf32> to vector<1x32xf32>
    %24 = vector.broadcast %23 : vector<1x32xf32> to vector<8x32xf32>
    %25 = arith.addf %21, %24 : vector<8x32xf32>
    %c0_12 = arith.constant 0 : index
    %c0_13 = arith.constant 0 : index
    %26 = vector.load %arg5[%c0_12, %c0_13] : memref<32x128xf32, #tpu.memory_space<vmem>>, vector<32x128xf32>
    %cst_14 = arith.constant dense<0.000000e+00> : vector<8x128xf32>
    %27 = tpu.matmul %25, %26, %cst_14 {dimension_numbers = #tpu.dot_dimension_numbers<[1], [0], [0], [1], [0, 0, 1, 1], [], []>} : vector<8x32xf32>, vector<32x128xf32>, vector<8x128xf32> -> vector<8x128xf32>
    %28 = vector.extract_strided_slice %27 {offsets = [0, 0], sizes = [8, 8], strides = [1, 1]} : vector<8x128xf32> to vector<8x8xf32>
    %c0_15 = arith.constant 0 : index
    %c0_16 = arith.constant 0 : index
    %29 = vector.load %arg6[%c0_15, %c0_16] : memref<1x8xf32, #tpu.memory_space<vmem>>, vector<1x8xf32>
    %30 = vector.broadcast %29 : vector<1x8xf32> to vector<8x8xf32>
    %31 = arith.addf %28, %30 : vector<8x8xf32>
    %c0_17 = arith.constant 0 : index
    %c0_18 = arith.constant 0 : index
    %c0_19 = arith.constant 0 : index
    %32 = vector.load %arg7[%c0_17, %c0_18, %c0_19] : memref<1x8x8xf32, #tpu.memory_space<vmem>>, vector<1x8x8xf32>
    %33 = vector.shape_cast %32 : vector<1x8x8xf32> to vector<8x8xf32>
    %34 = vector.shape_cast %31 : vector<8x8xf32> to vector<1x8x8xf32>
    tpu.vector_store %arg7[%c0_17, %c0_18, %c0_19], %34 {strides = array<i32>} : memref<1x8x8xf32, #tpu.memory_space<vmem>>, vector<1x8x8xf32>,
    return
  }
  func.func @transform_0(%arg0: i32, %arg1: i32) -> (i32, i32, i32) {
    %c0_i32 = arith.constant 0 : i32
    %c0_i32_0 = arith.constant 0 : i32
    return %arg0, %arg1, %c0_i32 : i32, i32, i32
  }
  func.func @transform_1(%arg0: i32, %arg1: i32) -> (i32, i32, i32) {
    %c0_i32 = arith.constant 0 : i32
    %c0_i32_0 = arith.constant 0 : i32
    %c0_i32_1 = arith.constant 0 : i32
    return %arg0, %c0_i32, %c0_i32_0 : i32, i32, i32
  }
  func.func @transform_2(%arg0: i32, %arg1: i32) -> (i32, i32, i32) {
    %c0_i32 = arith.constant 0 : i32
    %c0_i32_0 = arith.constant 0 : i32
    %c0_i32_1 = arith.constant 0 : i32
    return %arg0, %c0_i32, %c0_i32_0 : i32, i32, i32
  }
  func.func @transform_3(%arg0: i32, %arg1: i32) -> (i32, i32) {
    %c0_i32 = arith.constant 0 : i32
    %c0_i32_0 = arith.constant 0 : i32
    %c0_i32_1 = arith.constant 0 : i32
    return %c0_i32, %c0_i32_0 : i32, i32
  }
  func.func @transform_4(%arg0: i32, %arg1: i32) -> (i32, i32) {
    %c0_i32 = arith.constant 0 : i32
    %c0_i32_0 = arith.constant 0 : i32
    %c0_i32_1 = arith.constant 0 : i32
    return %c0_i32, %c0_i32_0 : i32, i32
  }
  func.func @transform_5(%arg0: i32, %arg1: i32) -> (i32, i32, i32) {
    %c0_i32 = arith.constant 0 : i32
    %c0_i32_0 = arith.constant 0 : i32
    return %arg0, %arg1, %c0_i32 : i32, i32, i32
  }
}

</mosaic_0001>

<bundles_post_ra>
// kernel: tpu_custom_call.1
= control target key start
LH: loop header
LB: loop body
LE: loop exit
PB: predicated region body
PF: predicated region fallthrough
CT: control target
= control target key end

     0   :  { %10 = vsyncpa [#allocation3], 0  ;;  %s1079_s0 = inlined_call_operand.hbm [shape: f32[2,8,32], index: 0, kind: input, shape index: {}]   ;;  %s1080_s1 = inlined_call_operand.vmem [shape: f32[2,1,32], index: 1, kind: input, shape index: {}]   ;;  %s1081_s2 = inlined_call_operand.vmem [shape: f32[2,1,32], index: 2, kind: input, shape index: {}]   ;;  %s1082_s3 = inlined_call_operand.hbm [shape: f32[32,128], index: 3, kind: input, shape index: {}]   ;;  %s1083_s4 = inlined_call_operand.vmem [shape: f32[1,8], index: 4, kind: input, shape index: {}]   ;;  %s1084_s5 = inlined_call_operand.hbm [shape: f32[2,8,8], index: 5, kind: output, shape index: {}]  }
   0x1   :  { %12 = vsyncpa [#allocation3 + $0x1], 0 }
   0x2   :  { %13 = vsyncpa [#allocation6], 0 }
   0x3   :  { %14 = vsyncpa [#allocation4], 0 }
   0x4   :  { %16 = vsyncpa [#allocation4 + $0x1], 0  ;;  %s847_s18 = smov 0   ;;  %s849_s19 = smov 0  }
   0x5   :  { %s851_s20 = smov 0   ;;  %s853_s21 = smov 0  }
   0x6   :  { %s855_s22 = smov 0   ;;  %s857_s23 = smov 0  }
   0x7 LB: > { %s542_s24 = sadd.s32 4294967295, %s807_s23   ;;  %s543_s25 = sadd.s32 4294967294, %s807_s23   ;;  %s807_s23 = sphi %s857_s23, %s22_s23   ;;  %s803_s22 = sphi %s855_s22, %s1108_s22   ;;  %s799_s21 = sphi %s853_s21, %s1107_s21   ;;  %s795_s20 = sphi %s851_s20, %s1106_s20   ;;  %s791_s19 = sphi %s849_s19, %s1105_s19   ;;  %s787_s18 = sphi %s847_s18, %s1104_s18  }
   0x8   : > { %p56_p0 = scmp.ne.s32.totalorder %s791_s19, %s787_s18  ;;  %p881_p1 = scmp.eq.s32.totalorder %s542_s24, 0 }
   0x9   : > { %p885_p2 = scmp.eq.s32.totalorder %s542_s24, 1  ;;  %p182_p3 = scmp.eq.s32.totalorder %s543_s25, 1 }
   0xa   : > { %s1089_s26 = scalar_select %p881_p1, 1, 0 }
   0xb   : > { %s1090_s27 = scalar_select %p885_p2, 1, 0 }
   0xc   : > { %p891_p4 = por %p881_p1, %p56_p0  ;;  %p544_p5 = scmp.ge.s32.totalorder %s807_s23, 1 }
   0xd   : > { %p896_p6 = por %p182_p3, %p56_p0  ;;  %p189_p7 = scmp.lt.s32.totalorder %s807_s23, 3 }
   0xe   : > { %s1091_s28 = scalar_select %p891_p4, 1, 0 }
   0xf   : > { %s1092_s29 = scalar_select %p896_p6, 1, 0 }
  0x10   : > { %p901_p8 = pnand %p544_p5, %p189_p7  ;;  %s809_s6 = smov [#allocation5]  }
  0x11   : > { %s201_s7 = sshll.u32 %s809_s6, 4  ;;  %s34_s9 = sadd.s32 1, %s803_s22  ;;  %s202_s7 = int_to_ptr.vmem [resolvable:$true] %s201_s7 }
  0x12   : > { %s1093_s30 = scalar_select %p901_p8, 1, 0 }
  0x13   : > { %p591_p9 = pneg %p901_p8  ;;  %s663_s12 = scalar_lea.hbm %s1082_s3, 512 }
  0x14   : > { %p664_p12 = scmp.ne.s32.totalorder %s1082_s3, %s663_s12  ;;  %p670_p5 = scmp.lt.u32.totalorder %s663_s12, %s1082_s3 }
  0x15   : > { %p910_p11 = pnand %p591_p9, %p881_p1 }
  0x17   : > { %p665_p13 = pneg %p910_p11 }
  0x19   : > { %p666_p0 = pnand %p665_p13, %p664_p12 }
  0x1b   : > { %p667_p3 = pneg %p666_p0 }
  0x1d   : > { %p672_p7 = pnand %p670_p5, %p667_p3 }
  0x1f   : > { %675 = shalt.err (!%p672_p7)
}
  0x20   : > { %s676_s17 = scalar_lea.vmem %s202_s7, 512  ;;  %p684_p1 = scmp.lt.s32.totalorder %s202_s7, %s202_s7 }
  0x21   : > { %p677_p9 = scmp.ne.s32.totalorder %s202_s7, %s676_s17  ;;  %p685_p4 = scmp.lt.s32.totalorder %s676_s17, %s676_s17 }
  0x23   : > { %p679_p10 = pnand %p677_p9, %p665_p13  ;;  %p686_p8 = por %p685_p4, %p684_p1 }
  0x25   : > { %p680_p6 = pneg %p679_p10 }
  0x27   : > { %p687_p2 = pnand %p686_p8, %p680_p6 }
  0x29   : > { %690 = shalt.err (!%p687_p2)
}
  0x2a   : > { %s810_s24 = smov 128   ;;  %s811_s25 = smov 8  }
  0x2b   : > { %594 = dma.hbm_to_vmem [thread:$0]  (!%p910_p11), %s1082_s3, 512, %s202_s7, [#allocation6], %s810_s24, %s810_s24, %s811_s25  }
  0x2c   : > { %p36_p1 = scmp.ge.s32.totalorder %s34_s9, 2  ;;  %s43_s11 = sadd.s32 1, %s795_s20 }
  0x2d   : > { %p50_p2 = scmp.ne.s32.totalorder %s795_s20, %s791_s19  ;;  %p51_p4 = scmp.eq.s32.totalorder %s807_s23, 0 }
  0x2e   : > { %s1110_s9 = smov (%p36_p1, %s34_s9), 0  ;;  %p1096_p8 = scmp.ne.s32.totalorder %s1090_s27, 0 }
  0x2f   : > { %p937_p6 = por %p51_p4, %p50_p2  ;;  %s38_s8 = ssub.s32 %s803_s22, %s1110_s9 }
  0x30   : > { %p943_p10 = por %p1096_p8, %p50_p2  ;;  %p604_p12 = scmp.lt.s32.totalorder %s807_s23, 2 }
  0x31   : > { %p41_p11 = scmp.eq.s32.totalorder %s38_s8, 0  ;;  %s218_s7 = sand.u32 1, %s795_s20  }
  0x32   : > { %s547_s14 = sshll.u32 %s218_s7, 3  ;;  %s548_s16 = sshll.u32 %s803_s22, 7 }
  0x33   : > { %s952_s15 = scalar_select %p41_p11, %s795_s20, %s43_s11  }
  0x34   : > { %s958_s25 = scalar_lea.hbm %s1079_s0, %s548_s16  ;;  %s222_s27 = scalar_lea.vmem [#allocation2], %s547_s14 }
  0x35   : > { %s230_s6 = sshll.u32 %s222_s27, 4  ;;  %p964_p13 = pnand %p604_p12, %p937_p6  ;;  %s960_s6 = int_to_ptr.vmem [resolvable:$true] %s230_s6 }
  0x36   : > { %s219_s11 = scalar_lea.sflag [#allocation3], %s218_s7  ;;  %s691_s8 = scalar_lea.hbm %s958_s25, 128 }
  0x37   : > { %p692_p0 = scmp.ne.s32.totalorder %s958_s25, %s691_s8  ;;  %p693_p3 = pneg %p964_p13 }
  0x38   : > { %s696_s17 = scalar_lea.hbm %s1079_s0, 256  ;;  %p697_p9 = scmp.lt.u32.totalorder %s958_s25, %s1079_s0 }
  0x39   : > { %p694_p5 = pnand %p693_p3, %p692_p0  ;;  %p698_p1 = scmp.lt.u32.totalorder %s696_s17, %s691_s8 }
  0x3a   : > { %p700_p4 = scmp.lt.u32.totalorder %s691_s8, %s958_s25 }
  0x3b   : > { %p695_p7 = pneg %p694_p5  ;;  %p699_p2 = por %p698_p1, %p697_p9 }
  0x3d   : > { %p701_p6 = por %p700_p4, %p699_p2 }
  0x3f   : > { %p702_p8 = pnand %p701_p6, %p695_p7 }
  0x41   : > { %705 = shalt.err (!%p702_p8)
}
  0x42   : > { %s706_s7 = scalar_lea.vmem %s960_s6, 128  ;;  %s812_s27 = smov [#allocation2]  }
  0x43   : > { %p707_p12 = scmp.ne.s32.totalorder %s960_s6, %s706_s7  ;;  %s711_s14 = sshll.u32 %s812_s27, 4  ;;  %s712_s14 = int_to_ptr.vmem [resolvable:$false] %s711_s14 }
  0x44   : > { %s713_s16 = scalar_lea.vmem %s712_s14, 256  ;;  %p714_p5 = scmp.lt.s32.totalorder %s960_s6, %s712_s14 }
  0x45   : > { %p709_p11 = pnand %p707_p12, %p693_p3  ;;  %p715_p9 = scmp.lt.s32.totalorder %s713_s16, %s706_s7 }
  0x47   : > { %p710_p0 = pneg %p709_p11  ;;  %p716_p1 = por %p715_p9, %p714_p5 }
  0x49   : > { %p717_p2 = pnand %p716_p1, %p710_p0 }
  0x4b   : > { %720 = shalt.err (!%p717_p2)
}
  0x4c   : > { %598 = dma.hbm_to_vmem [thread:$0]  (!%p964_p13), %s958_s25, 128, %s960_s6, %s219_s11  }
  0x4d   : > { %p1099_p7 = scmp.ne.s32.totalorder %s1093_s30, 0 }
  0x4e   : > { %s996_s8 = sand.u32 (!%p1099_p7), 1, %s791_s19   ;;  %p1100_p3 = scmp.ne.s32.totalorder (!%p1099_p7), %s1091_s28, 0 }
  0x4f   : > { %251 = sbr.rel (%p1099_p7) target bundleno = 632 (0x278), region = 40  ;;  %s550_s17 = sshll.u32 (!%p1099_p7), %s996_s8, 3 }
  0x50   : > { %s254_s12 = scalar_lea.sflag (!%p1099_p7), [#allocation3], %s996_s8  ;;  %s257_s24 = scalar_lea.vmem (!%p1099_p7), [#allocation2], %s550_s17 }
  0x56   : > { %774 = dma.done.wait (%p1100_p3), %s254_s12, 128  }
  0x57   : > { %776 = vsyncadd (%p1100_p3), %s254_s12, 4294967168  ;;  %p1101_p13 = scmp.ne.s32.totalorder %s1089_s26, 0 }
  0x59   : > { %778 = dma.done.wait (%p1101_p13), [#allocation6], 512  }
  0x5a   : > { %780 = vsyncadd (%p1101_p13), [#allocation6], 4294966784  ;;  %vm301_vm0 = vcmask 261120   ;;  %v300_v0 = vld [vmem:[%s257_s24] sm:$0xff]  ;;  %v332_v7 = vld [vmem:[#allocation5] sm:$0xff]  ;;  %v813_v10 = vmov 0.0|0.0  }
  0x5b   : > { %v302_v1 = vsel %vm301_vm0, %v300_v0, 0.0  ;;  %v333_v8 = vld [vmem:[#allocation5 + $0x8] sm:$0xff]  ;;  %v334_v9 = vld [vmem:[#allocation5 + $0x10] sm:$0xff]  ;;  %577 = vmatprep.subr.bf16.mxu0 %v813_v10  ;;  %v335_v12 = vld [vmem:[#allocation5 + $0x18] sm:$0xff]  ;;  %vm814_vm1 = vmmov 0   ;;  %v815_v13 = vmov 0.0  }
  0x5c   : > { %303 = vadd.xlane.f32.xlu0 %v302_v1  ;;  %v578_v11 = vpack.c.bf16 %v333_v8, %v332_v7  ;;  %574 = vmatprep.mubr.msk.f32.mxu0 %vm814_vm1, %v815_v13  ;;  %v581_v14 = vpack.c.bf16 %v335_v12, %v334_v9  ;;  %p294_p4 = scmp.lt.s32.totalorder %s799_s21, 1  ;;  %v556_v24 = vld [vmem:[%s1083_s4] ss:$0 sm:$0xff]  ;;  %s558_s14 = sshll.u32 %s799_s21, 7  ;;  %vm417_vm2 = vcmask 64512  }
  0x5d   : > { %s293_s16 = scalar_lea.vmem [#allocation7], %s550_s17  ;;  %s1030_s28 = scalar_lea.hbm %s1084_s5, %s558_s14 }
  0x5e   : > { %579 = vmatpush3.bf16.msra.mxu0 %v578_v11  ;;  %s295_s26 = scalar_select %p294_p4, %s799_s21, 1 }
  0x5f   : > { %580 = vmatprep.subr.bf16.mxu0 %v813_v10  ;;  %s434_s12 = sshll.u32 %s293_s16, 4  ;;  %s420_s30 = scalar_lea.sflag [#allocation4], %s996_s8  ;;  %s1032_s12 = int_to_ptr.vmem [resolvable:$true] %s434_s12 }
  0x60   : > { %s299_s25 = scalar_lea.vmem %s1081_s2, %s295_s26  ;;  %s296_s11 = scalar_lea.vmem %s1080_s1, %s295_s26 }
  0x61   : > { %v553_v19 = vld [vmem:[%s299_s25] ss:$0 sm:$0xff]  ;;  %s721_s21 = scalar_lea.vmem %s1032_s12, 128  ;;  %s816_s17 = smov [#allocation7]  }
  0x62   : > { %582 = vmatpush3.bf16.msra.mxu0 %v581_v14  ;;  %v554_v21 = vld [vmem:[%s296_s11] ss:$0 sm:$0xff]  ;;  %p722_p6 = scmp.ne.s32.totalorder %s1032_s12, %s721_s21  ;;  %s725_s25 = sshll.u32 %s816_s17, 4  ;;  %s726_s25 = int_to_ptr.vmem [resolvable:$false] %s725_s25 }
  0x63   : > { %s727_s6 = scalar_lea.vmem %s726_s25, 256  ;;  %p728_p11 = scmp.lt.s32.totalorder %s1032_s12, %s726_s25 }
  0x64   : > { %p723_p8 = pnand %p722_p6, %p943_p10  ;;  %p729_p0 = scmp.lt.s32.totalorder %s727_s6, %s721_s21 }
  0x66   : > { %p724_p12 = pneg %p723_p8  ;;  %p730_p5 = por %p729_p0, %p728_p11 }
  0x68   : > { %p731_p9 = pnand %p730_p5, %p724_p12 }
  0xe9   : > { %v304_v2 = vpop.xlane.xlu0 %303 }
  0xea   : > { %v306_v3 = vmul.f32 0.03125, %v304_v2 }
  0xec   : > { %v307_v4 = vsub.f32 %v300_v0, %v306_v3 }
  0xee   : > { %v308_v5 = vmul.f32 %v307_v4, %v307_v4 }
  0xf0   : > { %v309_v6 = vsel %vm301_vm0, %v308_v5, 0.0 }
  0xf1   : > { %310 = vadd.xlane.f32.xlu0 %v309_v6 }
 0x17e   : > { %v311_v15 = vpop.xlane.xlu0 %310 }
 0x17f   : > { %v312_v16 = vmul.f32 0.03125, %v311_v15 }
 0x181   : > { %v313_v17 = vadd.f32 1e-06, %v312_v16 }
 0x183   : > { %661 = vrsqrt.f32 %v313_v17 }
 0x18d   : > { %v662_v18 = vpop.eup %661 }
 0x18e   : > { %v315_v20 = vmul.f32 %v662_v18, %v307_v4 }
 0x190   : > { %v323_v22 = vmul.f32 %v553_v19, %v315_v20 }
 0x192   : > { %v331_v23 = vadd.f32 %v554_v21, %v323_v22 }
 0x194   : > { %575 = vmatmul.mubr.msk.f32.vlgmr.msra.gmra.mrb[0].mxu0 %vm301_vm0, %v331_v23 }
 0x267   : > { %v405_v25 = vpop.f32.mrb[0].mxu0 }
 0x268   : > { %v416_v26 = vadd.f32 %v556_v24, %v405_v25  ;;  %v576_v27 = vpop.f32.mrb[1].mxu0 }
 0x26a   : > { %418 = vst.msk [vmem:[%s293_s16] sm:$0xff] %vm417_vm2, %v416_v26 }
 0x26b   : > { %734 = shalt.err (!%p731_p9)
}
 0x26c   : > { %s735_s8 = scalar_lea.hbm %s1030_s28, 128  ;;  %s739_s7 = scalar_lea.hbm %s1084_s5, 256 }
 0x26d   : > { %p736_p1 = scmp.ne.s32.totalorder %s1030_s28, %s735_s8  ;;  %p740_p3 = scmp.lt.u32.totalorder %s1030_s28, %s1084_s5 }
 0x26e   : > { %p741_p13 = scmp.lt.u32.totalorder %s739_s7, %s735_s8  ;;  %p743_p6 = scmp.lt.u32.totalorder %s735_s8, %s1030_s28 }
 0x26f   : > { %p737_p2 = pnand %p736_p1, %p943_p10 }
 0x270   : > { %p742_p4 = por %p741_p13, %p740_p3 }
 0x271   : > { %p738_p7 = pneg %p737_p2 }
 0x272   : > { %p744_p8 = por %p743_p6, %p742_p4 }
 0x274   : > { %p745_p12 = pnand %p744_p8, %p738_p7 }
 0x276   : > { %748 = shalt.err (!%p745_p12)
}
 0x277   : > { %589 = dma.vmem_to_hbm [thread:$0]  (%p943_p10), %s1032_s12, 128, %s1030_s28, %s420_s30  }
 0x278 PF: > { %s446_s16 = sand.u32 1, %s787_s18   ;;  %p1102_p11 = scmp.ne.s32.totalorder %s1092_s29, 0 }
 0x279   : > { %p1103_p0 = scmp.ge.s32.totalorder %s807_s23, 2  ;;  %s447_s24 = scalar_lea.sflag [#allocation4], %s446_s16 }
 0x27b   : > { %p600_p5 = pnand %p1103_p0, %p1102_p11 }
 0x27d   : > { %782 = dma.done.wait (!%p600_p5), %s447_s24, 128  }
 0x27e   : > { %784 = vsyncadd (!%p600_p5), %s447_s24, 4294967168  ;;  %s22_s23 = sadd.s32 1, %s807_s23   ;;  %s1104_s18 = smov %s791_s19 }
 0x27f   : > { %p19_p9 = scmp.ge.s32.totalorder %s22_s23, 4   ;;  %s1105_s19 = smov %s795_s20 }
 0x280   : > { %s1106_s20 = smov %s952_s15  ;;  %s1107_s21 = smov %s803_s22 }
 0x281   : > { %s1108_s22 = smov %s1110_s9  ;;  %21 = sbr.rel (!%p19_p9) target bundleno = 7 (0x7), region = 95 }
 0x288   :  { %452 = vsyncpa [#allocation3], 1 }
 0x289   :  { %454 = vsyncpa [#allocation3 + $0x1], 1 }
 0x28a   :  { %455 = vsyncpa [#allocation6], 1 }
 0x28b   :  { %456 = vsyncpa [#allocation4], 1 }
 0x28c   :  { %458 = vsyncpa [#allocation4 + $0x1], 1 }

</bundles_post_ra>
